<compile_context>
chip_gen: v5e
topology: v5e:2x2
jax: 0.10.0
libtpu: 0.0.40
codegen_flags: <defaults>
</compile_context>

<pallas_src>
from functools import partial

import jax
import jax.numpy as jnp
from jax.experimental import pallas as pl
from jax.experimental.pallas import tpu as pltpu


def _qmeig_kernel(x_ref, w_ref, o_ref, *, dim_y, num_eig):
    # x_ref: (TB, dim_x)   w_ref: (dim_x, dim_y*num_eig)   o_ref: (TB, dim_y*dim_y)
    x = x_ref[...].astype(jnp.float32)
    w = w_ref[...].astype(jnp.float32)

    # Y (flattened over (j, k)): M[b, j*NE + k] = Y[b, j, k]
    m = jnp.dot(x, w, preferred_element_type=jnp.float32)      # (TB, dim_y*num_eig)

    # trace(Y Y^T) = sum of squares of all entries of Y
    tr = jnp.sum(m * m, axis=-1, keepdims=True)                 # (TB, 1)
    inv_tr = 1.0 / jnp.where(tr > 0.0, tr, 1.0)                 # guard padded tail rows

    # rho[b, j, l] = <Y[b, j, :], Y[b, l, :]>   (dim_y is small -> static unroll)
    cols = []
    for j in range(dim_y):
        yj = m[:, j * num_eig:(j + 1) * num_eig]
        for l in range(dim_y):
            yl = m[:, l * num_eig:(l + 1) * num_eig]
            cols.append(jnp.sum(yj * yl, axis=-1, keepdims=True))   # (TB, 1)
    rho = jnp.concatenate(cols, axis=-1) * inv_tr                # (TB, dim_y*dim_y)

    # single lane-dense full-block store
    o_ref[...] = rho.astype(o_ref.dtype)


def qmeasure_classif_eig_forward(x, eig_vec, eig_val, dim_y):
    """x: (batch, dim_x), eig_vec: (dim_x*dim_y, num_eig), eig_val: (num_eig,)
    -> rho: (batch, dim_y, dim_y), matching QMeasureClassifEig.forward."""
    batch, dim_x = x.shape
    dim_xy, num_eig = eig_vec.shape
    assert dim_xy == dim_x * dim_y, (dim_xy, dim_x, dim_y)

    # ---- parameter folding (weight-only; same math as the PyTorch forward) ----
    v = eig_vec / jnp.linalg.norm(eig_vec, axis=0, keepdims=True)     # column normalize
    p = jax.nn.relu(eig_val)
    p = p / jnp.sum(p)
    w = v * jnp.sqrt(p)[None, :]                                      # (dim_x*dim_y, num_eig)
    # reorder so that  M = x @ W  gives M[b, j*num_eig + k] = Y[b, j, k]
    w = w.reshape(dim_x, dim_y, num_eig).reshape(dim_x, dim_y * num_eig)
    w = w.astype(jnp.float32)
    x = x.astype(jnp.float32)

    # ---- batch tiling ----
    tb = batch if batch <= 512 else 512          # multiple of 8 when tiled; full dim otherwise
    grid = (pl.cdiv(batch, tb),)

    rho_flat = pl.pallas_call(
        partial(_qmeig_kernel, dim_y=dim_y, num_eig=num_eig),
        out_shape=jax.ShapeDtypeStruct((batch, dim_y * dim_y), jnp.float32),
        grid=grid,
        in_specs=[
            pl.BlockSpec((tb, dim_x), lambda i: (i, 0)),              # activations: tiled
            pl.BlockSpec((dim_x, dim_y * num_eig), lambda i: (0, 0)),  # weights: resident
        ],
        out_specs=pl.BlockSpec((tb, dim_y * dim_y), lambda i: (i, 0)),
        compiler_params=pltpu.CompilerParams(
            dimension_semantics=("parallel",),      # shard batch across TCs (v7x megacore)
        ),
    )(x, w)

    # trailing reshape is pure glue, done outside the kernel
    return rho_flat.reshape(batch, dim_y, dim_y)


def _reference(x, eig_vec, eig_val, dim_y):
    """Plain-JAX transcription of the PyTorch forward, for correctness checking."""
    dim_x = x.shape[-1]
    num_eig = eig_vec.shape[-1]
    v = eig_vec / jnp.linalg.norm(eig_vec, axis=0, keepdims=True)
    p = jax.nn.relu(eig_val)
    p = p / jnp.sum(p)
    v3 = v.reshape(dim_x, dim_y, num_eig)
    y = jnp.einsum('bi,ijk->bjk', x, v3)
    y = y * jnp.sqrt(p)[None, None, :]
    rho = jnp.einsum('bjk,blk->bjl', y, y)
    tr = jnp.trace(rho, axis1=-2, axis2=-1)[:, None, None]
    return rho / tr


if __name__ == "__main__":
    key = jax.random.PRNGKey(0)
    k1, k2, k3 = jax.random.split(key, 3)

    batch, dim_x, dim_y, num_eig = 8, 16, 4, 8

    x = jax.random.normal(k1, (batch, dim_x), dtype=jnp.float32)
    # Parameters: the PyTorch module draws these with torch.randn inside forward();
    # here they are deterministic inputs.  Ensure at least one eig_val is positive so
    # relu()/sum() is well defined.
    eig_vec = jax.random.normal(k2, (dim_x * dim_y, num_eig), dtype=jnp.float32)
    eig_val = jax.random.normal(k3, (num_eig,), dtype=jnp.float32)
    eig_val = eig_val.at[0].set(jnp.abs(eig_val[0]) + 1.0)

    out = jax.block_until_ready(qmeasure_classif_eig_forward(x, eig_vec, eig_val, dim_y))
    ref = _reference(x, eig_vec, eig_val, dim_y)

    assert out.shape == (batch, dim_y, dim_y), out.shape
    assert out.dtype == jnp.float32, out.dtype
    assert jnp.allclose(out, ref, atol=1e-5, rtol=1e-5), float(jnp.max(jnp.abs(out - ref)))

    # TODO(synk): set_rho() (torch.linalg.eigh eigendecomposition) is a host-side
    # parameter-initialization utility, not part of the forward pass; not ported.

    print("KERNEL_OK")
</pallas_src>

<mosaic_0001>
module attributes {stable_mosaic.version = 11 : i64} {
  func.func @_qmeig_kernel(%arg0: i32, %arg1: memref<8x16xf32, #tpu.memory_space<vmem>>, %arg2: memref<16x32xf32, #tpu.memory_space<vmem>>, %arg3: memref<8x16xf32, #tpu.memory_space<vmem>>) attributes {dimension_semantics = [#tpu.dimension_semantics<parallel>], iteration_bounds = array<i64: 1>, scalar_prefetch = 0 : i64, scratch_operands = 0 : i64, tpu.core_type = #tpu.core_type<tc>, window_params = [{transform_indices = @transform_0, window_bounds = array<i64: 8, 16>}, {pipeline_mode = #tpu.pipeline_mode<synchronous>, transform_indices = @transform_1, window_bounds = array<i64: 16, 32>}, {transform_indices = @transform_2, window_bounds = array<i64: 8, 16>}]} {
    %c0 = arith.constant 0 : index
    %c0_0 = arith.constant 0 : index
    %0 = vector.load %arg1[%c0, %c0_0] : memref<8x16xf32, #tpu.memory_space<vmem>>, vector<8x16xf32>
    %c0_1 = arith.constant 0 : index
    %c0_2 = arith.constant 0 : index
    %1 = vector.load %arg2[%c0_1, %c0_2] : memref<16x32xf32, #tpu.memory_space<vmem>>, vector<16x32xf32>
    %cst = arith.constant dense<0.000000e+00> : vector<8x32xf32>
    %2 = tpu.matmul %0, %1, %cst {dimension_numbers = #tpu.dot_dimension_numbers<[1], [0], [0], [1], [0, 0, 1, 1], [], []>} : vector<8x16xf32>, vector<16x32xf32>, vector<8x32xf32> -> vector<8x32xf32>
    %3 = arith.mulf %2, %2 : vector<8x32xf32>
    %cst_3 = arith.constant dense<0.000000e+00> : vector<8xf32>
    %4 = vector.multi_reduction <add>, %3, %cst_3 [1] : vector<8x32xf32> to vector<8xf32>
    %5 = vector.shape_cast %4 : vector<8xf32> to vector<8x1xf32>
    %cst_4 = arith.constant 0.000000e+00 : f32
    %6 = vector.broadcast %cst_4 : f32 to vector<8x1xf32>
    %7 = arith.cmpf ogt, %5, %6 : vector<8x1xf32>
    %cst_5 = arith.constant 1.000000e+00 : f32
    %8 = vector.broadcast %cst_5 : f32 to vector<8x1xf32>
    %9 = arith.select %7, %5, %8 : vector<8x1xi1>, vector<8x1xf32>
    %cst_6 = arith.constant 1.000000e+00 : f32
    %10 = vector.broadcast %cst_6 : f32 to vector<8x1xf32>
    %11 = arith.divf %10, %9 : vector<8x1xf32>
    %12 = vector.extract_strided_slice %2 {offsets = [0, 0], sizes = [8, 8], strides = [1, 1]} : vector<8x32xf32> to vector<8x8xf32>
    %13 = vector.extract_strided_slice %2 {offsets = [0, 0], sizes = [8, 8], strides = [1, 1]} : vector<8x32xf32> to vector<8x8xf32>
    %14 = arith.mulf %12, %13 : vector<8x8xf32>
    %cst_7 = arith.constant dense<0.000000e+00> : vector<8xf32>
    %15 = vector.multi_reduction <add>, %14, %cst_7 [1] : vector<8x8xf32> to vector<8xf32>
    %16 = vector.shape_cast %15 : vector<8xf32> to vector<8x1xf32>
    %17 = vector.extract_strided_slice %2 {offsets = [0, 8], sizes = [8, 8], strides = [1, 1]} : vector<8x32xf32> to vector<8x8xf32>
    %18 = arith.mulf %12, %17 : vector<8x8xf32>
    %cst_8 = arith.constant dense<0.000000e+00> : vector<8xf32>
    %19 = vector.multi_reduction <add>, %18, %cst_8 [1] : vector<8x8xf32> to vector<8xf32>
    %20 = vector.shape_cast %19 : vector<8xf32> to vector<8x1xf32>
    %21 = vector.extract_strided_slice %2 {offsets = [0, 16], sizes = [8, 8], strides = [1, 1]} : vector<8x32xf32> to vector<8x8xf32>
    %22 = arith.mulf %12, %21 : vector<8x8xf32>
    %cst_9 = arith.constant dense<0.000000e+00> : vector<8xf32>
    %23 = vector.multi_reduction <add>, %22, %cst_9 [1] : vector<8x8xf32> to vector<8xf32>
    %24 = vector.shape_cast %23 : vector<8xf32> to vector<8x1xf32>
    %25 = vector.extract_strided_slice %2 {offsets = [0, 24], sizes = [8, 8], strides = [1, 1]} : vector<8x32xf32> to vector<8x8xf32>
    %26 = arith.mulf %12, %25 : vector<8x8xf32>
    %cst_10 = arith.constant dense<0.000000e+00> : vector<8xf32>
    %27 = vector.multi_reduction <add>, %26, %cst_10 [1] : vector<8x8xf32> to vector<8xf32>
    %28 = vector.shape_cast %27 : vector<8xf32> to vector<8x1xf32>
    %29 = vector.extract_strided_slice %2 {offsets = [0, 8], sizes = [8, 8], strides = [1, 1]} : vector<8x32xf32> to vector<8x8xf32>
    %30 = vector.extract_strided_slice %2 {offsets = [0, 0], sizes = [8, 8], strides = [1, 1]} : vector<8x32xf32> to vector<8x8xf32>
    %31 = arith.mulf %29, %30 : vector<8x8xf32>
    %cst_11 = arith.constant dense<0.000000e+00> : vector<8xf32>
    %32 = vector.multi_reduction <add>, %31, %cst_11 [1] : vector<8x8xf32> to vector<8xf32>
    %33 = vector.shape_cast %32 : vector<8xf32> to vector<8x1xf32>
    %34 = vector.extract_strided_slice %2 {offsets = [0, 8], sizes = [8, 8], strides = [1, 1]} : vector<8x32xf32> to vector<8x8xf32>
    %35 = arith.mulf %29, %34 : vector<8x8xf32>
    %cst_12 = arith.constant dense<0.000000e+00> : vector<8xf32>
    %36 = vector.multi_reduction <add>, %35, %cst_12 [1] : vector<8x8xf32> to vector<8xf32>
    %37 = vector.shape_cast %36 : vector<8xf32> to vector<8x1xf32>
    %38 = vector.extract_strided_slice %2 {offsets = [0, 16], sizes = [8, 8], strides = [1, 1]} : vector<8x32xf32> to vector<8x8xf32>
    %39 = arith.mulf %29, %38 : vector<8x8xf32>
    %cst_13 = arith.constant dense<0.000000e+00> : vector<8xf32>
    %40 = vector.multi_reduction <add>, %39, %cst_13 [1] : vector<8x8xf32> to vector<8xf32>
    %41 = vector.shape_cast %40 : vector<8xf32> to vector<8x1xf32>
    %42 = vector.extract_strided_slice %2 {offsets = [0, 24], sizes = [8, 8], strides = [1, 1]} : vector<8x32xf32> to vector<8x8xf32>
    %43 = arith.mulf %29, %42 : vector<8x8xf32>
    %cst_14 = arith.constant dense<0.000000e+00> : vector<8xf32>
    %44 = vector.multi_reduction <add>, %43, %cst_14 [1] : vector<8x8xf32> to vector<8xf32>
    %45 = vector.shape_cast %44 : vector<8xf32> to vector<8x1xf32>
    %46 = vector.extract_strided_slice %2 {offsets = [0, 16], sizes = [8, 8], strides = [1, 1]} : vector<8x32xf32> to vector<8x8xf32>
    %47 = vector.extract_strided_slice %2 {offsets = [0, 0], sizes = [8, 8], strides = [1, 1]} : vector<8x32xf32> to vector<8x8xf32>
    %48 = arith.mulf %46, %47 : vector<8x8xf32>
    %cst_15 = arith.constant dense<0.000000e+00> : vector<8xf32>
    %49 = vector.multi_reduction <add>, %48, %cst_15 [1] : vector<8x8xf32> to vector<8xf32>
    %50 = vector.shape_cast %49 : vector<8xf32> to vector<8x1xf32>
    %51 = vector.extract_strided_slice %2 {offsets = [0, 8], sizes = [8, 8], strides = [1, 1]} : vector<8x32xf32> to vector<8x8xf32>
    %52 = arith.mulf %46, %51 : vector<8x8xf32>
    %cst_16 = arith.constant dense<0.000000e+00> : vector<8xf32>
    %53 = vector.multi_reduction <add>, %52, %cst_16 [1] : vector<8x8xf32> to vector<8xf32>
    %54 = vector.shape_cast %53 : vector<8xf32> to vector<8x1xf32>
    %55 = vector.extract_strided_slice %2 {offsets = [0, 16], sizes = [8, 8], strides = [1, 1]} : vector<8x32xf32> to vector<8x8xf32>
    %56 = arith.mulf %46, %55 : vector<8x8xf32>
    %cst_17 = arith.constant dense<0.000000e+00> : vector<8xf32>
    %57 = vector.multi_reduction <add>, %56, %cst_17 [1] : vector<8x8xf32> to vector<8xf32>
    %58 = vector.shape_cast %57 : vector<8xf32> to vector<8x1xf32>
    %59 = vector.extract_strided_slice %2 {offsets = [0, 24], sizes = [8, 8], strides = [1, 1]} : vector<8x32xf32> to vector<8x8xf32>
    %60 = arith.mulf %46, %59 : vector<8x8xf32>
    %cst_18 = arith.constant dense<0.000000e+00> : vector<8xf32>
    %61 = vector.multi_reduction <add>, %60, %cst_18 [1] : vector<8x8xf32> to vector<8xf32>
    %62 = vector.shape_cast %61 : vector<8xf32> to vector<8x1xf32>
    %63 = vector.extract_strided_slice %2 {offsets = [0, 24], sizes = [8, 8], strides = [1, 1]} : vector<8x32xf32> to vector<8x8xf32>
    %64 = vector.extract_strided_slice %2 {offsets = [0, 0], sizes = [8, 8], strides = [1, 1]} : vector<8x32xf32> to vector<8x8xf32>
    %65 = arith.mulf %63, %64 : vector<8x8xf32>
    %cst_19 = arith.constant dense<0.000000e+00> : vector<8xf32>
    %66 = vector.multi_reduction <add>, %65, %cst_19 [1] : vector<8x8xf32> to vector<8xf32>
    %67 = vector.shape_cast %66 : vector<8xf32> to vector<8x1xf32>
    %68 = vector.extract_strided_slice %2 {offsets = [0, 8], sizes = [8, 8], strides = [1, 1]} : vector<8x32xf32> to vector<8x8xf32>
    %69 = arith.mulf %63, %68 : vector<8x8xf32>
    %cst_20 = arith.constant dense<0.000000e+00> : vector<8xf32>
    %70 = vector.multi_reduction <add>, %69, %cst_20 [1] : vector<8x8xf32> to vector<8xf32>
    %71 = vector.shape_cast %70 : vector<8xf32> to vector<8x1xf32>
    %72 = vector.extract_strided_slice %2 {offsets = [0, 16], sizes = [8, 8], strides = [1, 1]} : vector<8x32xf32> to vector<8x8xf32>
    %73 = arith.mulf %63, %72 : vector<8x8xf32>
    %cst_21 = arith.constant dense<0.000000e+00> : vector<8xf32>
    %74 = vector.multi_reduction <add>, %73, %cst_21 [1] : vector<8x8xf32> to vector<8xf32>
    %75 = vector.shape_cast %74 : vector<8xf32> to vector<8x1xf32>
    %76 = vector.extract_strided_slice %2 {offsets = [0, 24], sizes = [8, 8], strides = [1, 1]} : vector<8x32xf32> to vector<8x8xf32>
    %77 = arith.mulf %63, %76 : vector<8x8xf32>
    %cst_22 = arith.constant dense<0.000000e+00> : vector<8xf32>
    %78 = vector.multi_reduction <add>, %77, %cst_22 [1] : vector<8x8xf32> to vector<8xf32>
    %79 = vector.shape_cast %78 : vector<8xf32> to vector<8x1xf32>
    %80 = tpu.concatenate %16, %20, %24, %28, %33, %37, %41, %45, %50, %54, %58, %62, %67, %71, %75, %79 in 1 : vector<8x1xf32>, vector<8x1xf32>, vector<8x1xf32>, vector<8x1xf32>, vector<8x1xf32>, vector<8x1xf32>, vector<8x1xf32>, vector<8x1xf32>, vector<8x1xf32>, vector<8x1xf32>, vector<8x1xf32>, vector<8x1xf32>, vector<8x1xf32>, vector<8x1xf32>, vector<8x1xf32>, vector<8x1xf32> -> vector<8x16xf32>
    %81 = vector.broadcast %11 : vector<8x1xf32> to vector<8x16xf32>
    %82 = arith.mulf %80, %81 : vector<8x16xf32>
    %c0_23 = arith.constant 0 : index
    %c0_24 = arith.constant 0 : index
    %83 = vector.load %arg3[%c0_23, %c0_24] : memref<8x16xf32, #tpu.memory_space<vmem>>, vector<8x16xf32>
    tpu.vector_store %arg3[%c0_23, %c0_24], %82 {strides = array<i32>} : memref<8x16xf32, #tpu.memory_space<vmem>>, vector<8x16xf32>,
    return
  }
  func.func @transform_0(%arg0: i32) -> (i32, i32) {
    %c0_i32 = arith.constant 0 : i32
    %c0_i32_0 = arith.constant 0 : i32
    return %arg0, %c0_i32 : i32, i32
  }
  func.func @transform_1(%arg0: i32) -> (i32, i32) {
    %c0_i32 = arith.constant 0 : i32
    %c0_i32_0 = arith.constant 0 : i32
    %c0_i32_1 = arith.constant 0 : i32
    return %c0_i32, %c0_i32_0 : i32, i32
  }
  func.func @transform_2(%arg0: i32) -> (i32, i32) {
    %c0_i32 = arith.constant 0 : i32
    %c0_i32_0 = arith.constant 0 : i32
    return %arg0, %c0_i32 : i32, i32
  }
}

</mosaic_0001>

<bundles_post_ra>
// kernel: tpu_custom_call.1
= control target key start
LH: loop header
LB: loop body
LE: loop exit
PB: predicated region body
PF: predicated region fallthrough
CT: control target
= control target key end

     0   :  { %7 = vsyncpa [#allocation3], 0  ;;  %s339_s0 = inlined_call_operand.hbm [shape: f32[8,16], index: 0, kind: input, shape index: {}]   ;;  %s340_s1 = inlined_call_operand.hbm [shape: f32[16,32], index: 1, kind: input, shape index: {}]   ;;  %s341_s2 = inlined_call_operand.hbm [shape: f32[8,16], index: 2, kind: output, shape index: {}]  }
   0x1   :  { %8 = vsyncpa [#allocation6], 0 }
   0x2   :  { %9 = vsyncpa [#allocation4], 0  ;;  %s15_s11 = sshll.u32 %s339_s0, 4  ;;  %s294_s12 = smov [#allocation2]   ;;  %s16_s11 = int_to_ptr.hbm [resolvable:$true] %s15_s11 }
   0x3   :  { %s17_s13 = sshll.u32 %s294_s12, 4  ;;  %s25_s16 = sshll.u32 %s340_s1, 4  ;;  %s18_s13 = int_to_ptr.vmem [resolvable:$true] %s17_s13  ;;  %s26_s16 = int_to_ptr.hbm [resolvable:$true] %s25_s16 }
   0x4   :  { %20 = dma.hbm_to_vmem [thread:$0]  %s16_s11, 128, %s18_s13, [#allocation3]  }
   0x5   :  { %s295_s17 = smov [#allocation5]   ;;  %s296_s19 = smov 128  }
   0x6   :  { %s27_s18 = sshll.u32 %s295_s17, 4  ;;  %s297_s20 = smov 8   ;;  %s28_s18 = int_to_ptr.vmem [resolvable:$true] %s27_s18 }
   0x7   :  { %33 = dma.hbm_to_vmem [thread:$0]  %s26_s16, 256, %s28_s18, [#allocation6], %s296_s19, %s296_s19, %s297_s20  }
   0x8   :  { %288 = dma.done.wait [#allocation3], 128  }
   0x9   :  { %289 = vsyncadd [#allocation3], 4294967168 }
   0xa   :  { %290 = dma.done.wait [#allocation6], 256  }
   0xb   :  { %291 = vsyncadd [#allocation6], 4294967040  ;;  %v44_v0 = vld [vmem:[#allocation5 + $0x8] sm:$0xff]  ;;  %v43_v1 = vld [vmem:[#allocation5] sm:$0xff]  ;;  %vm45_vm0 = vcmask 130048   ;;  %s298_s0 = smov 104  }
   0xc   :  { %63 = vmatpush.msra.mxu0 %v44_v0  ;;  %v42_v2 = vld [vmem:[#allocation2] sm:$0xff]  ;;  %s299_s1 = smov 112   ;;  %s300_s21 = smov 120   ;;  %vm70_vm1 = vcmask 261120   ;;  %vm91_vm2 = vcmask 64512   ;;  %vm156_vm4 = vcmask 7168  }
   0xd   :  { %vm158_vm5 = vcmask 15360   ;;  %vm160_vm6 = vcmask 23552   ;;  %vm162_vm7 = vcmask 31744   ;;  %vm164_vm8 = vcmask 39936   ;;  %s301_s22 = smov [#allocation7]   ;;  %s194_s26 = sshll.u32 %s341_s2, 4  ;;  %s195_s26 = int_to_ptr.hbm [resolvable:$true] %s194_s26 }
   0xe   :  { %64 = vmatpush.msra.mxu0 %v43_v1  ;;  %vm166_vm9 = vcmask 48128   ;;  %vm168_vm10 = vcmask 56320   ;;  %vm171_vm11 = vcmask 72704   ;;  %vm173_vm12 = vcmask 80896   ;;  %s192_s23 = sshll.u32 %s301_s22, 4  ;;  %s193_s23 = int_to_ptr.vmem [resolvable:$true] %s192_s23 }
   0xf   :  { %205 = vmatmul.msk.f32.vlgmr.msra.gmra.mxu0 %vm45_vm0, %v42_v2  ;;  %vm175_vm13 = vcmask 89088   ;;  %vm177_vm14 = vcmask 97280   ;;  %vm179_vm15 = vcmask 105472  }
  0x8c   :  { %v66_v3 = vpop.f32.mrf.mxu0 }
  0x8d   :  { %110 = vrot.lane.b32.xlu0 %v66_v3, %s298_s0  ;;  %103 = vrot.lane.b32.xlu2 %v66_v3, %s299_s1  ;;  %v69_v4 = vmul.f32 %v66_v3, %v66_v3 }
  0x8e   :  { %96 = vrot.lane.b32.xlu1 %v66_v3, %s300_s21 }
  0x8f   :  { %v71_v5 = vsel %vm70_vm1, %v69_v4, 0.0  ;;  %v92_v6 = vsel %vm91_vm2, %v69_v4, 0.0 }
  0x95   :  { %118 = vrot.lane.b32.xlu2 %v69_v4, %s300_s21 }
  0x96   :  { %138 = vrot.lane.b32.xlu1 %v69_v4, %s299_s1 }
  0xb7   :  { %72 = vadd.xlane.f32.xlu0 %v71_v5 }
  0xbf   :  { %93 = vadd.xlane.f32.xlu0 %v92_v6 }
  0xe7   :  { %v104_v7 = vpop.permute.xlu2 %103 }
  0xe8   :  { %v106_v8 = vmul.f32 %v104_v7, %v66_v3 }
  0xea   :  { %132 = vrot.lane.b32.xlu0 %v106_v8, %s300_s21  ;;  %v107_v9 = vsel %vm91_vm2, %v106_v8, 0.0 }
  0xeb   :  { %108 = vadd.xlane.f32.xlu2 %v107_v9 }
  0xef   :  { %v119_v18 = vpop.permute.xlu2 %118 }
  0xf0   :  { %v121_v19 = vsel %vm91_vm2, %v119_v18, 0.0 }
  0xf2   :  { %150 = vrot.lane.b32.xlu0 %v69_v4, %s298_s0 }
  0xff   :  { %v111_v12 = vpop.permute.xlu0 %110 }
 0x100   :  { %v97_v10 = vpop.permute.xlu1 %96  ;;  %v113_v13 = vmul.f32 %v111_v12, %v66_v3 }
 0x101   :  { %v99_v11 = vmul.f32 %v97_v10, %v66_v3 }
 0x102   :  { %v114_v14 = vsel %vm91_vm2, %v113_v13, 0.0 }
 0x103   :  { %125 = vrot.lane.b32.xlu1 %v99_v11, %s300_s21  ;;  %v100_v17 = vsel %vm91_vm2, %v99_v11, 0.0 }
 0x108   :  { %v139_v15 = vpop.permute.xlu1 %138 }
 0x109   :  { %v141_v16 = vsel %vm91_vm2, %v139_v15, 0.0 }
 0x10b   :  { %144 = vrot.lane.b32.xlu1 %v99_v11, %s299_s1 }
 0x11c   :  { %115 = vadd.xlane.f32.xlu0 %v114_v14 }
 0x124   :  { %142 = vadd.xlane.f32.xlu0 %v141_v16 }
 0x12a   :  { %v73_v20 = vpop.xlane.xlu0 %72 }
 0x12b   :  { %vm74_vm3 = vcmp.gt.f32.partialorder %v73_v20, 0.0 }
 0x12c   :  { %v75_v31 = vsel %vm74_vm3, %v73_v20, 1.0 }
 0x12d   :  { %214 = vrcp.f32 %v75_v31  ;;  %v87_v56 = vand.u32 2147483648, %v75_v31  ;;  %vm81_vm3 = vweird.f32 %v75_v31  ;;  %v85_v57 = vand.u32 2147483647, %v75_v31 }
 0x12f   :  { %v88_v60 = vor.u32 1.1754944e-38, %v87_v56 }
 0x132   :  { %v94_v21 = vpop.xlane.xlu0 %93 }
 0x133   :  { %v215_v36 = vpop.eup %214 }
 0x134   :  { %v77_v39 = vmul.f32 %v215_v36, %v75_v31  ;;  %vm82_vm1 = vweird.f32 %v215_v36 }
 0x135   :  { %101 = vadd.xlane.f32.xlu1 %v100_v17 }
 0x136   :  { %v78_v45 = vsub.f32 1.0, %v77_v39 }
 0x138   :  { %v79_v49 = vmul.f32 %v215_v36, %v78_v45 }
 0x13a   :  { %v80_v55 = vadd.f32 %v215_v36, %v79_v49 }
 0x13d   :  { %122 = vadd.xlane.f32.xlu1 %v121_v19 }
 0x15c   :  { %v133_v22 = vpop.permute.xlu0 %132 }
 0x15d   :  { %v135_v23 = vsel %vm91_vm2, %v133_v22, 0.0 }
 0x15e   :  { %136 = vadd.xlane.f32.xlu1 %v135_v23  ;;  %v109_v33 = vpop.xlane.xlu2 %108 }
 0x164   :  { %v151_v28 = vpop.permute.xlu0 %150 }
 0x165   :  { %v153_v29 = vsel %vm91_vm2, %v151_v28, 0.0 }
 0x175   :  { %v126_v24 = vpop.permute.xlu1 %125 }
 0x176   :  { %v128_v25 = vsel %vm91_vm2, %v126_v24, 0.0 }
 0x177   :  { %129 = vadd.xlane.f32.xlu2 %v128_v25 }
 0x17d   :  { %v145_v26 = vpop.permute.xlu1 %144 }
 0x17e   :  { %v147_v27 = vsel %vm91_vm2, %v145_v26, 0.0 }
 0x17f   :  { %148 = vadd.xlane.f32.xlu2 %v147_v27 }
 0x187   :  { %154 = vadd.xlane.f32.xlu2 %v153_v29 }
 0x18f   :  { %v116_v37 = vpop.xlane.xlu0 %115 }
 0x197   :  { %v143_v50 = vpop.xlane.xlu0 %142 }
 0x1a8   :  { %v102_v30 = vpop.xlane.xlu1 %101 }
 0x1a9   :  { %v157_v32 = vsel %vm156_vm4, %v94_v21, %v102_v30  ;;  %vm181_vm4 = vcmask 113664  }
 0x1aa   :  { %v159_v34 = vsel %vm158_vm5, %v157_v32, %v109_v33  ;;  %vm83_vm5 = vmor %vm81_vm3, %vm82_vm1 }
 0x1ab   :  { %v161_v38 = vsel %vm160_vm6, %v159_v34, %v116_v37  ;;  %v84_v59 = vsel %vm83_vm5, %v215_v36, %v80_v55  ;;  %vm86_vm6 = vcmp.eq.f32.partialorder %v85_v57, 8.507059e+37 }
 0x1ac   :  { %v163_v40 = vsel %vm162_vm7, %v161_v38, %v102_v30  ;;  %v89_v63 = vsel %vm86_vm6, %v88_v60, %v84_v59 }
 0x1b0   :  { %v123_v35 = vpop.xlane.xlu1 %122 }
 0x1b1   :  { %v165_v41 = vsel %vm164_vm8, %v163_v40, %v123_v35 }
 0x1d1   :  { %v137_v43 = vpop.xlane.xlu1 %136 }
 0x1ea   :  { %v130_v42 = vpop.xlane.xlu2 %129 }
 0x1eb   :  { %v167_v44 = vsel %vm166_vm9, %v165_v41, %v130_v42 }
 0x1ec   :  { %v169_v46 = vsel %vm168_vm10, %v167_v44, %v137_v43 }
 0x1ed   :  { %v170_v47 = vsel %vm91_vm2, %v169_v46, %v109_v33  ;;  %vm183_vm2 = vcmask 121856  }
 0x1ee   :  { %v172_v48 = vsel %vm171_vm11, %v170_v47, %v130_v42 }
 0x1ef   :  { %v174_v52 = vsel %vm173_vm12, %v172_v48, %v143_v50 }
 0x1f2   :  { %v149_v51 = vpop.xlane.xlu2 %148 }
 0x1f3   :  { %v176_v53 = vsel %vm175_vm13, %v174_v52, %v149_v51 }
 0x1f4   :  { %v178_v54 = vsel %vm177_vm14, %v176_v53, %v116_v37 }
 0x1f5   :  { %v180_v58 = vsel %vm179_vm15, %v178_v54, %v137_v43 }
 0x1f6   :  { %v182_v61 = vsel %vm181_vm4, %v180_v58, %v149_v51 }
 0x1fa   :  { %v155_v62 = vpop.xlane.xlu2 %154 }
 0x1fb   :  { %v184_v0 = vsel %vm183_vm2, %v182_v61, %v155_v62 }
 0x1fc   :  { %v185_v1 = vmul.f32 %v184_v0, %v89_v63 }
 0x1fe   :  { %186 = vst.msk [vmem:[#allocation7] sm:$0xff] %vm45_vm0, %v185_v1 }
 0x1ff   :  { %197 = dma.vmem_to_hbm [thread:$0]  %s193_s23, 128, %s195_s26, [#allocation4]  }
 0x200   :  { %292 = dma.done.wait [#allocation4], 128  }
 0x201   :  { %293 = vsyncadd [#allocation4], 4294967168 }
 0x202   :  { %202 = vsyncpa [#allocation3], 1 }
 0x203   :  { %203 = vsyncpa [#allocation6], 1 }
 0x204   :  { %204 = vsyncpa [#allocation4], 1 }

</bundles_post_ra>
